<compile_context>
chip_gen: v7x
topology: tpu7x:2x2x1
jax: 0.10.0
libtpu: 0.0.40
codegen_flags: <defaults>
</compile_context>

<pallas_src>
import jax
import jax.numpy as jnp
from jax.experimental import pallas as pl
from jax.experimental.pallas import tpu as pltpu


def _round_up(x, m):
    return ((x + m - 1) // m) * m


def mlp_kernel(x_ref, w1_ref, b1_ref, w2_ref, b2_ref, o_ref):
    # Cast x to bf16 in-kernel (VPU filler) so the wrapper never copies x in HBM.
    x = x_ref[...].astype(jnp.bfloat16)
    # dot1 on the MXU: bf16 operands, f32 accumulation.
    h = jnp.dot(x, w1_ref[...], preferred_element_type=jnp.float32)
    # Bias + ReLU in bf16: halves VPU work / vreg traffic on v6e/v7x bf16 VALUs.
    h = jnp.maximum(h.astype(jnp.bfloat16) + b1_ref[...], 0.0)
    # dot2: bf16 operands, f32 accumulation; bias add in f32; single cast to bf16.
    o = jnp.dot(h, w2_ref[...], preferred_element_type=jnp.float32)
    o_ref[...] = (o + b2_ref[...]).astype(o_ref.dtype)


def my_sequential_forward(x, w1, b1, w2, b2, *, block_batch=2048):
    """Fused Linear(20,256) -> ReLU -> Linear(256,10). Weights stored (in, out)."""
    B, in_dim = x.shape
    hidden = w1.shape[1]
    out_dim = w2.shape[1]

    # ---- batch tiling -------------------------------------------------------
    if B <= 8:
        tb = B                                       # exact block, no masking
    else:
        n_tiles = max(2, pl.cdiv(B, block_batch))    # >=2 steps so v7x uses 2 TCs
        tb = _round_up(pl.cdiv(B, n_tiles), 8)       # <8 ghost rows per tile
    grid = (pl.cdiv(B, tb),)

    # One-time casts of the tiny, VMEM-resident operands (weights / biases).
    w1_b = w1.astype(jnp.bfloat16)
    b1_b = b1.reshape(1, hidden).astype(jnp.bfloat16)
    w2_b = w2.astype(jnp.bfloat16)
    b2_f = b2.reshape(1, out_dim).astype(jnp.float32)

    cost = pl.CostEstimate(
        flops=2 * B * (in_dim * hidden + hidden * out_dim),
        transcendentals=0,
        bytes_accessed=(x.size * x.dtype.itemsize + w1_b.size * 2 + b1_b.size * 2
                        + w2_b.size * 2 + b2_f.size * 4 + B * out_dim * 2),
    )

    out_bf16 = pl.pallas_call(
        mlp_kernel,
        out_shape=jax.ShapeDtypeStruct((B, out_dim), jnp.bfloat16),
        grid_spec=pltpu.PrefetchScalarGridSpec(
            num_scalar_prefetch=0,
            grid=grid,
            in_specs=[
                pl.BlockSpec((tb, in_dim), lambda i: (i, 0)),       # x: streamed
                pl.BlockSpec((in_dim, hidden), lambda i: (0, 0)),   # W1: resident
                pl.BlockSpec((1, hidden), lambda i: (0, 0)),        # b1: resident
                pl.BlockSpec((hidden, out_dim), lambda i: (0, 0)),  # W2: resident
                pl.BlockSpec((1, out_dim), lambda i: (0, 0)),       # b2: resident
            ],
            out_specs=pl.BlockSpec((tb, out_dim), lambda i: (i, 0)),
        ),
        compiler_params=pltpu.CompilerParams(
            dimension_semantics=("parallel",),
        ),
        cost_estimate=cost,
    )(x, w1_b, b1_b, w2_b, b2_f)

    # Narrow bf16 result -> caller dtype (no row/lane slicing needed: no padding).
    return out_bf16.astype(x.dtype)


def init_params(key, in_dim=20, hidden_dim=256, out_dim=10, dtype=jnp.float32):
    """Deterministic init mimicking PyTorch nn.Linear default (uniform +-1/sqrt(fan_in))."""
    k1, k2, k3, k4 = jax.random.split(key, 4)
    bound1 = 1.0 / jnp.sqrt(in_dim)
    bound2 = 1.0 / jnp.sqrt(hidden_dim)
    # stored as (in, out) == transposed PyTorch weight
    w1 = jax.random.uniform(k1, (in_dim, hidden_dim), dtype, -bound1, bound1)
    b1 = jax.random.uniform(k2, (1, hidden_dim), dtype, -bound1, bound1)
    w2 = jax.random.uniform(k3, (hidden_dim, out_dim), dtype, -bound2, bound2)
    b2 = jax.random.uniform(k4, (1, out_dim), dtype, -bound2, bound2)
    return w1, b1, w2, b2


if __name__ == "__main__":
    key = jax.random.PRNGKey(0)
    kx, kp = jax.random.split(key)

    # X = torch.rand(2, 20)  -> uniform [0, 1)
    x = jax.random.uniform(kx, (2, 20), jnp.float32)
    w1, b1, w2, b2 = init_params(kp)

    out = my_sequential_forward(x, w1, b1, w2, b2)
    out = jax.block_until_ready(out)

    # pure-JAX f32 reference; bf16 MXU operands + bf16 output -> loosened tolerance
    ref = jnp.maximum(x @ w1 + b1, 0.0) @ w2 + b2
    assert out.shape == (2, 10), out.shape
    assert jnp.allclose(out, ref, atol=2e-2, rtol=2e-2), "mismatch vs reference"

    print("KERNEL_OK")
</pallas_src>

<mosaic_0001>
module attributes {stable_mosaic.version = 11 : i64} {
  func.func @mlp_kernel(%arg0: i32, %arg1: memref<2x20xf32, #tpu.memory_space<vmem>>, %arg2: memref<20x256xbf16, #tpu.memory_space<vmem>>, %arg3: memref<1x256xbf16, #tpu.memory_space<vmem>>, %arg4: memref<256x10xbf16, #tpu.memory_space<vmem>>, %arg5: memref<1x10xf32, #tpu.memory_space<vmem>>, %arg6: memref<2x10xbf16, #tpu.memory_space<vmem>>) attributes {dimension_semantics = [#tpu.dimension_semantics<parallel>], iteration_bounds = array<i64: 1>, scalar_prefetch = 0 : i64, scratch_operands = 0 : i64, tpu.core_type = #tpu.core_type<tc>, window_params = [{transform_indices = @transform_0, window_bounds = array<i64: 2, 20>}, {pipeline_mode = #tpu.pipeline_mode<synchronous>, transform_indices = @transform_1, window_bounds = array<i64: 20, 256>}, {pipeline_mode = #tpu.pipeline_mode<synchronous>, transform_indices = @transform_2, window_bounds = array<i64: 1, 256>}, {pipeline_mode = #tpu.pipeline_mode<synchronous>, transform_indices = @transform_3, window_bounds = array<i64: 256, 10>}, {pipeline_mode = #tpu.pipeline_mode<synchronous>, transform_indices = @transform_4, window_bounds = array<i64: 1, 10>}, {transform_indices = @transform_5, window_bounds = array<i64: 2, 10>}]} {
    %c0 = arith.constant 0 : index
    %c0_0 = arith.constant 0 : index
    %0 = vector.load %arg1[%c0, %c0_0] : memref<2x20xf32, #tpu.memory_space<vmem>>, vector<2x20xf32>
    %1 = arith.truncf %0 : vector<2x20xf32> to vector<2x20xbf16>
    %c0_1 = arith.constant 0 : index
    %c0_2 = arith.constant 0 : index
    %2 = vector.load %arg2[%c0_1, %c0_2] : memref<20x256xbf16, #tpu.memory_space<vmem>>, vector<20x256xbf16>
    %cst = arith.constant dense<0.000000e+00> : vector<2x256xf32>
    %3 = tpu.matmul %1, %2, %cst {dimension_numbers = #tpu.dot_dimension_numbers<[1], [0], [0], [1], [0, 0, 1, 1], [], []>} : vector<2x20xbf16>, vector<20x256xbf16>, vector<2x256xf32> -> vector<2x256xf32>
    %4 = arith.truncf %3 : vector<2x256xf32> to vector<2x256xbf16>
    %c0_3 = arith.constant 0 : index
    %c0_4 = arith.constant 0 : index
    %5 = vector.load %arg3[%c0_3, %c0_4] : memref<1x256xbf16, #tpu.memory_space<vmem>>, vector<1x256xbf16>
    %6 = vector.broadcast %5 : vector<1x256xbf16> to vector<2x256xbf16>
    %7 = arith.addf %4, %6 : vector<2x256xbf16>
    %cst_5 = arith.constant 0.000000e+00 : bf16
    %8 = vector.broadcast %cst_5 : bf16 to vector<2x256xbf16>
    %9 = arith.maximumf %7, %8 : vector<2x256xbf16>
    %c0_6 = arith.constant 0 : index
    %c0_7 = arith.constant 0 : index
    %10 = vector.load %arg4[%c0_6, %c0_7] : memref<256x10xbf16, #tpu.memory_space<vmem>>, vector<256x10xbf16>
    %cst_8 = arith.constant dense<0.000000e+00> : vector<2x10xf32>
    %11 = tpu.matmul %9, %10, %cst_8 {dimension_numbers = #tpu.dot_dimension_numbers<[1], [0], [0], [1], [0, 0, 1, 1], [], []>} : vector<2x256xbf16>, vector<256x10xbf16>, vector<2x10xf32> -> vector<2x10xf32>
    %c0_9 = arith.constant 0 : index
    %c0_10 = arith.constant 0 : index
    %12 = vector.load %arg5[%c0_9, %c0_10] : memref<1x10xf32, #tpu.memory_space<vmem>>, vector<1x10xf32>
    %13 = vector.broadcast %12 : vector<1x10xf32> to vector<2x10xf32>
    %14 = arith.addf %11, %13 : vector<2x10xf32>
    %15 = arith.truncf %14 : vector<2x10xf32> to vector<2x10xbf16>
    %c0_11 = arith.constant 0 : index
    %c0_12 = arith.constant 0 : index
    %16 = vector.load %arg6[%c0_11, %c0_12] : memref<2x10xbf16, #tpu.memory_space<vmem>>, vector<2x10xbf16>
    tpu.vector_store %arg6[%c0_11, %c0_12], %15 {strides = array<i32>} : memref<2x10xbf16, #tpu.memory_space<vmem>>, vector<2x10xbf16>,
    return
  }
  func.func @transform_0(%arg0: i32) -> (i32, i32) {
    %c0_i32 = arith.constant 0 : i32
    %c0_i32_0 = arith.constant 0 : i32
    return %arg0, %c0_i32 : i32, i32
  }
  func.func @transform_1(%arg0: i32) -> (i32, i32) {
    %c0_i32 = arith.constant 0 : i32
    %c0_i32_0 = arith.constant 0 : i32
    %c0_i32_1 = arith.constant 0 : i32
    return %c0_i32, %c0_i32_0 : i32, i32
  }
  func.func @transform_2(%arg0: i32) -> (i32, i32) {
    %c0_i32 = arith.constant 0 : i32
    %c0_i32_0 = arith.constant 0 : i32
    %c0_i32_1 = arith.constant 0 : i32
    return %c0_i32, %c0_i32_0 : i32, i32
  }
  func.func @transform_3(%arg0: i32) -> (i32, i32) {
    %c0_i32 = arith.constant 0 : i32
    %c0_i32_0 = arith.constant 0 : i32
    %c0_i32_1 = arith.constant 0 : i32
    return %c0_i32, %c0_i32_0 : i32, i32
  }
  func.func @transform_4(%arg0: i32) -> (i32, i32) {
    %c0_i32 = arith.constant 0 : i32
    %c0_i32_0 = arith.constant 0 : i32
    %c0_i32_1 = arith.constant 0 : i32
    return %c0_i32, %c0_i32_0 : i32, i32
  }
  func.func @transform_5(%arg0: i32) -> (i32, i32) {
    %c0_i32 = arith.constant 0 : i32
    %c0_i32_0 = arith.constant 0 : i32
    return %arg0, %c0_i32 : i32, i32
  }
}

</mosaic_0001>

<bundles_post_ra>
// kernel: tpu_custom_call.1
= control target key start
LH: loop header
LB: loop body
LE: loop exit
PB: predicated region body
PF: predicated region fallthrough
CT: control target
= control target key end

     0   :  { %vm46_vm0 = vcmask 1041408   ;;  %v424_v3 = vmov 0   ;;  %vm42_vm1 = vcmask 162816   ;;  %s538_s0 = inlined_call_operand.vmem [shape: f32[2,20], index: 0, kind: input, shape index: {}]   ;;  %s539_s1 = inlined_call_operand.vmem [shape: bf16[20,256], index: 1, kind: input, shape index: {}]   ;;  %s540_s2 = inlined_call_operand.vmem [shape: bf16[1,256], index: 2, kind: input, shape index: {}]   ;;  %s541_s3 = inlined_call_operand.vmem [shape: bf16[256,10], index: 3, kind: input, shape index: {}]   ;;  %s542_s4 = inlined_call_operand.vmem [shape: f32[1,10], index: 4, kind: input, shape index: {}]   ;;  %s543_s5 = inlined_call_operand.hbm [shape: bf16[2,10], index: 5, kind: output, shape index: {}]  }
   0x1   :  { %v379_v0 = vld [vmem:[%s539_s1 + $0x4] ss:$8 sps:$4 sm:$0xff]   ;;  %v381_v1 = vld [vmem:[%s539_s1] ss:$8 sps:$4 sm:$0xff]   ;;  %v26_v2 = vld [vmem:[%s539_s1 + $0x10] sm:$0x33]  ;;  %85 = vmatprep.mubr.bf16.mxu0 %v424_v3 }
   0x2   :  { %v22_v4 = vld [vmem:[%s538_s0] sm:$0x3]  ;;  %53 = vmatprep.subr.bf16.mxu0 %v379_v0  ;;  %v333_v5 = vcombine.high %v26_v2, %v26_v2  ;;  %v332_v6 = vcombine.low %v26_v2, %v26_v2  ;;  %v386_v10 = vld [vmem:[%s541_s3 + $0x48] sm:$0xff]   ;;  %v388_v13 = vld [vmem:[%s541_s3 + $0x50] sm:$0xff]  }
   0x3   :  { %v384_v7 = vld [vmem:[%s541_s3 + $0x40] sm:$0xff]   ;;  %54 = vmatpush1.bf16.msra.mxu0 %v381_v1  ;;  %v387_v11 = vld [vmem:[%s541_s3 + $0x8] sm:$0xff]   ;;  %v23_v12 = vpack.c.bf16 %v22_v4, %v22_v4  ;;  %v389_v14 = vld [vmem:[%s541_s3 + $0x10] sm:$0xff]  }
   0x4   :  { %v385_v8 = vld [vmem:[%s541_s3] sm:$0xff]   ;;  %334 = vmatprep.subr.msk.bf16.mxu0 %vm46_vm0, %v333_v5  ;;  %v48_v9 = vsel %vm46_vm0, %v332_v6, 0  ;;  %354 = vmatprep.subr.bf16.mxu1 %v384_v7  ;;  %v390_v15 = vld [vmem:[%s541_s3 + $0x58] sm:$0xff]  }
   0x5   :  { %355 = vmatpush3.bf16.msra.mxu1 %v385_v8  ;;  %v391_v16 = vld [vmem:[%s541_s3 + $0x18] sm:$0xff]   ;;  %v392_v17 = vld [vmem:[%s541_s3 + $0x60] sm:$0xff]  }
   0x6   :  { %356 = vmatprep.subr.bf16.mxu1 %v386_v10 }
   0x7   :  { %56 = vmatpush1.bf16.msra.mxu0 %v48_v9 }
   0x9   :  { %357 = vmatpush3.bf16.msra.mxu1 %v387_v11 }
   0xa   :  { %335 = vmatmul.mubr.msk.bf16.vlgmr.msra.gmra.mrb[0].mxu0 %vm42_vm1, %v23_v12  ;;  %358 = vmatprep.subr.bf16.mxu1 %v388_v13 }
   0xd   :  { %359 = vmatpush3.bf16.msra.mxu1 %v389_v14 }
   0xe   :  { %360 = vmatprep.subr.bf16.mxu1 %v390_v15 }
   0xf   :  { %10 = vsyncpa [#allocation3], 0  ;;  %v393_v18 = vld [vmem:[%s541_s3 + $0x20] sm:$0xff]   ;;  %v394_v19 = vld [vmem:[%s541_s3 + $0x68] sm:$0xff]   ;;  %v425_v25 = vmov 1966171168   ;;  %v109_v27 = vlaneseq }
  0x10   :  { %v395_v20 = vld [vmem:[%s541_s3 + $0x28] sm:$0xff]   ;;  %v396_v21 = vld [vmem:[%s541_s3 + $0x70] sm:$0xff]   ;;  %v398_v23 = vld [vmem:[%s541_s3 + $0x78] sm:$0xff]   ;;  %v107_v26 = vunpack.c.l.s4 %v425_v25  ;;  %s426_s6 = smov [#allocation2]   ;;  %vm314_vm2 = vcmask 73728  }
  0x11   :  { %361 = vmatpush3.bf16.msra.mxu1 %v391_v16  ;;  %v397_v22 = vld [vmem:[%s541_s3 + $0x30] sm:$0xff]   ;;  %v399_v24 = vld [vmem:[%s541_s3 + $0x38] sm:$0xff]   ;;  %v110_v29 = vshrl.u32 %v109_v27, 7  ;;  %v337_v51 = vld [vmem:[%s542_s4] ss:$0 sm:$0xff]  ;;  %s322_s7 = sshll.u32 %s426_s6, 4  ;;  %s323_s7 = int_to_ptr.vmem [resolvable:$true] %s322_s7 }
  0x12   :  { %362 = vmatprep.subr.bf16.mxu1 %v392_v17  ;;  %v108_v28 = vunpack.c.0.s8 %v107_v26  ;;  %v336_v30 = vld.sshfl [vmem:[%s540_s2] sm:$0x11 pattern:$0x75316420]  ;;  %s400_s8 = scalar_lea.vmem %s323_s7, 16  ;;  %s404_s9 = scalar_lea.vmem %s323_s7, 32 }
  0x13   :  { %v105_v32 = vcombine.high %v336_v30, %v336_v30  ;;  %v125_v36 = vsub.s32 0, %v110_v29  ;;  %p401_p0 = scmp.ne.s32.totalorder %s323_s7, %s400_s8  ;;  %p405_p1 = scmp.lt.s32.totalorder %s323_s7, %s323_s7 }
  0x14   :  { %v111_v31 = vsub.s32 %v108_v28, %v110_v29  ;;  %p406_p2 = scmp.lt.s32.totalorder %s404_s9, %s400_s8 }
  0x15   :  { %363 = vmatpush3.bf16.msra.mxu1 %v393_v18 }
  0x16   :  { %364 = vmatprep.subr.bf16.mxu1 %v394_v19  ;;  %v112_v33 = vrot.slane %v336_v30, %v111_v31  ;;  %v119_v34 = vrot.slane %v105_v32, %v111_v31  ;;  %p407_p3 = por %p406_p2, %p405_p1 }
  0x18   :  { %v121_v35 = vpack.i.b16 %v112_v33, %v112_v33  ;;  %v128_v37 = vpack.i.b16 %v119_v34, %v119_v34  ;;  %p408_p4 = pnand %p407_p3, %p401_p0 }
  0x19   :  { %365 = vmatpush3.bf16.msra.mxu1 %v395_v20 }
  0x1a   :  { %366 = vmatprep.subr.bf16.mxu1 %v396_v21  ;;  %v126_v38 = vrot.slane %v121_v35, %v125_v36  ;;  %v133_v40 = vrot.slane %v128_v37, %v125_v36 }
  0x1d   :  { %367 = vmatpush3.bf16.msra.mxu1 %v397_v22 }
  0x1e   :  { %368 = vmatprep.subr.bf16.mxu1 %v398_v23 }
  0x21   :  { %369 = vmatpush3.bf16.msra.mxu1 %v399_v24 }
  0xdd   :  { %v87_v39 = vpop.f32.mrb[0].mxu0 }
  0xde   :  { %v94_v41 = vpack.c.bf16 %v87_v39, %v87_v39  ;;  %v89_v42 = vpop.f32.mrb[1].mxu0 }
  0xdf   :  { %v95_v43 = vpack.c.bf16 %v89_v42, %v89_v42  ;;  %v91_v44 = vpop.f32.mrb[2].mxu0 }
  0xe0   :  { %v134_v45 = vadd.bf16 %v126_v38, %v94_v41  ;;  %v92_v46 = vpop.f32.mrb[3].mxu0 }
  0xe1   :  { %v135_v47 = vadd.bf16 %v133_v40, %v95_v43 }
  0xe2   :  { %v136_v49 = vmax.bf16 %v424_v3, %v134_v45 }
  0xe3   :  { %v137_v48 = vmax.bf16 %v424_v3, %v135_v47 }
  0xe5   :  { %305 = vmatprep.mubr.bf16.mxu1 %v137_v48 }
  0xe6   :  { %306 = vmatmul.mubr.bf16.vlgmr.msra.gmra.mrb[0].mxu1 %v136_v49 }
 0x1b9   :  { %v370_v50 = vpop.f32.mrb[0].mxu1 }
 0x1ba   :  { %v371_v52 = vpop.f32.mrb[1].mxu1 }
 0x1bb   :  { %v372_v53 = vadd.f32 %v371_v52, %v370_v50  ;;  %v373_v54 = vpop.f32.mrb[2].mxu1 }
 0x1bc   :  { %v374_v55 = vpop.f32.mrb[3].mxu1 }
 0x1bd   :  { %v308_v56 = vadd.f32 %v372_v53, %v337_v51 }
 0x1bf   :  { %v313_v57 = vpack.c.bf16 %v308_v56, %v308_v56 }
 0x1c1   :  { %315 = vst.msk [vmem:[#allocation2] sm:$0x1] %vm314_vm2, %v313_v57 }
 0x1c2   :  { %411 = shalt.err (!%p408_p4)
}
 0x1c3   :  { %s412_s11 = scalar_lea.hbm %s543_s5, 16 }
 0x1c4   :  { %p413_p5 = scmp.ne.s32.totalorder %s543_s5, %s412_s11  ;;  %p416_p6 = scmp.lt.u32.totalorder %s412_s11, %s543_s5 }
 0x1c6   :  { %p418_p7 = pnand %p416_p6, %p413_p5 }
 0x1c8   :  { %421 = shalt.err (!%p418_p7)
}
 0x1c9   :  { %325 = dma.vmem_to_hbm [thread:$0]  %s323_s7, 16, %s543_s5, [#allocation3]  }
 0x1ca   :  { %422 = dma.done.wait [#allocation3], 16  }
 0x1cb   :  { %423 = vsyncadd [#allocation3], 4294967280 }
 0x1cc   :  { %329 = vsyncpa [#allocation3], 1 }

</bundles_post_ra>
